<compile_context>
chip_gen: v6e
topology: v6e:2x2x1
jax: 0.10.0
libtpu: 0.0.40
codegen_flags: <defaults>
</compile_context>

<pallas_src>
import functools
import itertools
import math

import jax
import jax.numpy as jnp
from jax.experimental import pallas as pl
from jax.experimental.pallas import tpu as pltpu


# ---------------------------------------------------------------------------
# Hardware policy
# ---------------------------------------------------------------------------

@functools.lru_cache(maxsize=1)
def _hw_policy():
    """(target block bytes, scoped-VMEM limit bytes, #TensorCores per chip)."""
    vmem_bytes = 64 << 20                       # conservative default (v7x per-TC)
    try:
        info = pltpu.get_tpu_info()
        vmem_bytes = int(getattr(info, "vmem_capacity_bytes", vmem_bytes)) or vmem_bytes
    except Exception:
        pass
    cores = 1
    try:
        kind = str(getattr(jax.devices()[0], "device_kind", "")).lower()
        if "v7" in kind:
            cores = 2                           # megacore: shard "parallel" grid axes
    except Exception:
        pass
    # 4 live buffers (input + output, double-buffered): keep them ~<= 1/4 of VMEM.
    # 128 MiB (v5e/v6e) -> 8 MiB blocks; 64 MiB (v7x) -> 4 MiB blocks.
    target_bytes = max(1 << 20, min(8 << 20, vmem_bytes // 16))
    vmem_limit = int(min(vmem_bytes * 3 // 4, 96 << 20))
    return target_bytes, vmem_limit, cores


def _pick_batch_block(B, row_bytes, target_bytes, cores):
    """Largest batch chunk whose block stays under `target_bytes`.  On multi-core
    chips also aim for >=2 grid steps per TensorCore, but never shrink blocks
    below ~1 MiB just to create steps."""
    row_bytes = max(1, row_bytes)
    bblk = max(1, min(B, target_bytes // row_bytes))
    if cores > 1 and B > 1:
        want_steps = min(B, 2 * cores)
        steps_bblk = -(-B // want_steps)               # bblk giving >= want_steps steps
        min_bblk = max(1, (1 << 20) // row_bytes)      # keep blocks >= ~1 MiB
        bblk = min(bblk, max(steps_bblk, min_bblk))
    return max(1, min(bblk, B))


# ---------------------------------------------------------------------------
# Host-side permutation simplification
# ---------------------------------------------------------------------------

def _coalesce(p, T):
    """Merge trailing axes that remain adjacent and in-order under `p`.

    p[j] = input trailing axis feeding output trailing position j (static).
    Returns the equivalent (p', T') over merged axes."""
    d = len(p)
    groups = []                                   # runs of consecutive input axes
    j = 0
    while j < d:
        start = j
        while j + 1 < d and p[j + 1] == p[j] + 1:
            j += 1
        groups.append(tuple(range(p[start], p[j] + 1)))
        j += 1
    order = sorted(range(len(groups)), key=lambda g: groups[g][0])
    new_axis = {g: i for i, g in enumerate(order)}      # output-group id -> new input axis
    new_T = [0] * len(groups)
    for g, axes in enumerate(groups):
        new_T[new_axis[g]] = math.prod(T[a] for a in axes)
    new_p = tuple(new_axis[g] for g in range(len(groups)))
    return new_p, tuple(new_T)


# ---------------------------------------------------------------------------
# Kernels
# ---------------------------------------------------------------------------

def _swap_kernel(x_ref, o_ref):
    # Whole-block batched minor transpose: Mosaic interleaves vld / XLU-transpose
    # / vst per (8,128) tile.  No per-volume Python loop (unbounded live ranges).
    o_ref[...] = jnp.swapaxes(x_ref[...], -1, -2)


def _make_general_kernel(p, T):
    """Permute trailing axes of a (bblk, *T) block into order `p` (d >= 3 after
    coalescing: neither identity nor a plain 2-axis swap)."""
    d = len(p)
    m = p[d - 1]                          # input axis that lands on the output lane axis
    if m == d - 1:                        # lane axis stays -> contiguous slab copies
        do_swap, k2 = False, d - 2
    else:                                 # lane axis moves -> per-slab minor transpose
        do_swap, k2 = True, p.index(d - 1)
    kept_out = (k2, d - 1)
    loop_pos = tuple(j for j in range(d) if j not in kept_out)
    loop_sizes = tuple(T[p[j]] for j in loop_pos)

    def kernel(x_ref, o_ref):
        # The lane (last) axis of both refs always stays a full slice; only
        # leading / sublane axes are integer-indexed.
        # TODO(synk): for very large loop counts, distribute these slabs over
        # extra "arbitrary" grid axes via BlockSpec index_maps instead of
        # unrolling them inside one full-volume block.
        for combo in itertools.product(*(range(s) for s in loop_sizes)):
            in_idx = [slice(None)] * (1 + d)
            out_idx = [slice(None)] * (1 + d)
            for pos, i in zip(loop_pos, combo):
                in_idx[1 + p[pos]] = i
                out_idx[1 + pos] = i
            tile = x_ref[tuple(in_idx)]
            if do_swap:
                tile = jnp.swapaxes(tile, -1, -2)
            o_ref[tuple(out_idx)] = tile

    return kernel


# ---------------------------------------------------------------------------
# Memoized pallas_call builder (only d! distinct permutations per shape/dtype)
# ---------------------------------------------------------------------------

@functools.lru_cache(maxsize=None)
def _build_permute_call(p, T, B, dtype):
    target_bytes, vmem_limit, cores = _hw_policy()
    item = dtype.itemsize
    d = len(p)
    out_T = tuple(T[a] for a in p)
    cost = pl.CostEstimate(flops=0, transcendentals=0,
                           bytes_accessed=2 * B * math.prod(T) * item)

    if d == 2:                                   # plain swap of the two trailing axes
        T0, T1 = T
        t0, t1 = T0, T1
        if T0 * T1 * item > target_bytes:
            # Very large volumes: 128-aligned trailing tiles keep both the input
            # block (.., t0, t1) and the transposed output block (.., t1, t0)
            # layout-friendly.
            if T1 % 128 == 0 and T1 > 512:
                t1 = 512
            if T0 % 128 == 0 and T0 > 512 and t0 * t1 * item > target_bytes:
                t0 = 512
        bblk = _pick_batch_block(B, t0 * t1 * item, target_bytes, cores)
        grid = (-(-B // bblk), -(-T0 // t0), -(-T1 // t1))
        return pl.pallas_call(
            _swap_kernel,
            out_shape=jax.ShapeDtypeStruct((B, T1, T0), dtype),
            grid_spec=pltpu.PrefetchScalarGridSpec(
                num_scalar_prefetch=0,
                grid=grid,
                in_specs=[pl.BlockSpec((bblk, t0, t1), lambda b, i, j: (b, i, j))],
                out_specs=pl.BlockSpec((bblk, t1, t0), lambda b, i, j: (b, j, i)),
            ),
            compiler_params=pltpu.CompilerParams(
                dimension_semantics=("parallel", "parallel", "parallel"),
                vmem_limit_bytes=vmem_limit),
            cost_estimate=cost,
        )

    # General residual permutation (d >= 3): full-volume blocks per batch chunk.
    vol_bytes = math.prod(T) * item
    bblk = _pick_batch_block(B, vol_bytes, target_bytes, cores)
    zeros = (0,) * d
    return pl.pallas_call(
        _make_general_kernel(p, T),
        out_shape=jax.ShapeDtypeStruct((B,) + out_T, dtype),
        grid_spec=pltpu.PrefetchScalarGridSpec(
            num_scalar_prefetch=0,
            grid=(-(-B // bblk),),
            in_specs=[pl.BlockSpec((bblk,) + T, lambda b: (b,) + zeros)],
            out_specs=pl.BlockSpec((bblk,) + out_T, lambda b: (b,) + zeros),
        ),
        compiler_params=pltpu.CompilerParams(
            dimension_semantics=("parallel",),
            vmem_limit_bytes=vmem_limit),
        cost_estimate=cost,
    )


# ---------------------------------------------------------------------------
# Public wrapper
# ---------------------------------------------------------------------------

def random_permute_nd(x: jax.Array, dims: int, key: jax.Array) -> jax.Array:
    """Pallas implementation of RandomPermuteNd.forward.

    The permutation is sampled host-side (mirroring `-torch.randperm(dims) - 1`
    plus the .item() calls in the reference), so `key` must be concrete: the
    output layout is a trace-time constant, exactly like the PyTorch module.
    """
    nd = x.ndim
    d = int(dims)
    assert 1 <= d <= nd

    randperm = [int(v) for v in jax.random.permutation(key, d)]
    trail = tuple(d - 1 - r for r in randperm)     # output trailing pos j <- input trailing axis
    T_full = x.shape[nd - d:]
    out_shape = x.shape[:nd - d] + tuple(T_full[a] for a in trail)

    # Simplify: merge adjacent in-order trailing axes, then fold a leading
    # in-place group into the flattened batch.
    p, T = _coalesce(trail, T_full)
    B = math.prod(x.shape[:nd - d])
    if p and p[0] == 0:
        B *= T[0]
        p = tuple(a - 1 for a in p[1:])
        T = T[1:]

    if len(p) <= 1 or p == tuple(range(len(p))):
        return x                                   # identity permutation: zero data movement

    call = _build_permute_call(p, T, B, x.dtype)
    out2 = call(x.reshape((B,) + T))
    return out2.reshape(out_shape)


# ---------------------------------------------------------------------------
# Self-test
# ---------------------------------------------------------------------------

if __name__ == "__main__":
    root = jax.random.PRNGKey(0)
    k_data, k_data2, *perm_keys = jax.random.split(root, 8)

    def check(x, dims, k_perm):
        out = jax.block_until_ready(random_permute_nd(x, dims, k_perm))
        randperm = [int(v) for v in jax.random.permutation(k_perm, dims)]
        trail = tuple(dims - 1 - r for r in randperm)
        full_perm = tuple(range(x.ndim - dims)) + tuple(x.ndim - dims + a for a in trail)
        ref = jnp.transpose(x, full_perm)
        assert out.shape == ref.shape and out.dtype == x.dtype
        assert bool(jnp.array_equal(out, ref))

    # RandomPermuteNd(dims=2) on an NCHW batch; 128x128 trailing dims keep every
    # block fully lane-dense.  Several keys so both the identity fast path and
    # the transposing kernel are exercised (the pallas_call is compiled once and
    # reused thanks to the lru_cache).
    x = jax.random.normal(k_data, (2, 4, 128, 128), dtype=jnp.float32)
    for k in perm_keys[:4]:
        check(x, 2, k)

    # Awkward extents: non-power-of-two flattened batch (B = 15) and a 16-wide
    # sublane axis whose swap produces lane-masked output stores.
    x_small = jax.random.normal(k_data2, (3, 5, 16, 128), dtype=jnp.float32)
    for k in perm_keys[4:6]:
        check(x_small, 2, k)

    print("KERNEL_OK")
</pallas_src>

<mosaic_0001>
module attributes {stable_mosaic.version = 11 : i64} {
  func.func @_swap_kernel(%arg0: i32, %arg1: i32, %arg2: i32, %arg3: memref<8x128x128xf32, #tpu.memory_space<vmem>>, %arg4: memref<8x128x128xf32, #tpu.memory_space<vmem>>) attributes {dimension_semantics = [#tpu.dimension_semantics<parallel>, #tpu.dimension_semantics<parallel>, #tpu.dimension_semantics<parallel>], iteration_bounds = array<i64: 1, 1, 1>, scalar_prefetch = 0 : i64, scratch_operands = 0 : i64, tpu.core_type = #tpu.core_type<tc>, window_params = [{transform_indices = @transform_0, window_bounds = array<i64: 8, 128, 128>}, {transform_indices = @transform_1, window_bounds = array<i64: 8, 128, 128>}]} {
    %c0 = arith.constant 0 : index
    %c0_0 = arith.constant 0 : index
    %c0_1 = arith.constant 0 : index
    %0 = vector.load %arg3[%c0, %c0_0, %c0_1] : memref<8x128x128xf32, #tpu.memory_space<vmem>>, vector<8x128x128xf32>
    %1 = tpu.transpose %0, [0, 2, 1] : vector<8x128x128xf32> -> vector<8x128x128xf32>
    %c0_2 = arith.constant 0 : index
    %c0_3 = arith.constant 0 : index
    %c0_4 = arith.constant 0 : index
    %2 = vector.load %arg4[%c0_2, %c0_3, %c0_4] : memref<8x128x128xf32, #tpu.memory_space<vmem>>, vector<8x128x128xf32>
    tpu.vector_store %arg4[%c0_2, %c0_3, %c0_4], %1 {strides = array<i32>} : memref<8x128x128xf32, #tpu.memory_space<vmem>>, vector<8x128x128xf32>,
    return
  }
  func.func @transform_0(%arg0: i32, %arg1: i32, %arg2: i32) -> (i32, i32, i32) {
    %c0_i32 = arith.constant 0 : i32
    return %arg0, %arg1, %arg2 : i32, i32, i32
  }
  func.func @transform_1(%arg0: i32, %arg1: i32, %arg2: i32) -> (i32, i32, i32) {
    %c0_i32 = arith.constant 0 : i32
    return %arg0, %arg2, %arg1 : i32, i32, i32
  }
}

</mosaic_0001>

<bundles_post_ra>
// kernel: tpu_custom_call.1
= control target key start
LH: loop header
LB: loop body
LE: loop exit
PB: predicated region body
PF: predicated region fallthrough
CT: control target
= control target key end

     0   :  { %6 = vsyncpa [#allocation3], 0  ;;  %s626_s0 = inlined_call_operand.hbm [shape: f32[8,128,128], index: 0, kind: input, shape index: {}]   ;;  %s627_s1 = inlined_call_operand.hbm [shape: f32[8,128,128], index: 1, kind: output, shape index: {}]  }
   0x1   :  { %7 = vsyncpa [#allocation4], 0  ;;  %s600_s6 = smov [#allocation2]  }
   0x2   :  { %s13_s7 = sshll.u32 %s600_s6, 4  ;;  %s14_s7 = int_to_ptr.vmem [resolvable:$true] %s13_s7 }
   0x3   :  { %s564_s8 = scalar_lea.vmem %s14_s7, 16384  ;;  %p569_p1 = scmp.lt.s32.totalorder %s14_s7, %s14_s7 }
   0x4   :  { %p565_p0 = scmp.ne.s32.totalorder %s14_s7, %s564_s8  ;;  %p570_p2 = scmp.lt.s32.totalorder %s564_s8, %s564_s8 }
   0x6   :  { %p571_p3 = por %p570_p2, %p569_p1 }
   0x8   :  { %p572_p4 = pnand %p571_p3, %p565_p0 }
   0xa   :  { %575 = shalt.err (!%p572_p4)
}
   0xb   :  { %s601_s9 = smov 128   ;;  %s602_s10 = smov 8  }
   0xc   :  { %19 = dma.hbm_to_vmem [thread:$0]  %s626_s0, 16384, %s14_s7, [#allocation3], %s601_s9, %s601_s9, %s602_s10  }
   0xd   :  { %596 = dma.done.wait [#allocation3], 16384  }
   0xe   :  { %597 = vsyncadd [#allocation3], 4294950912  ;;  %v39_v0 = vld [vmem:[#allocation2 + $0x80] sm:$0xff]  ;;  %v40_v2 = vld [vmem:[#allocation2 + $0x88] sm:$0xff]  ;;  %s603_s0 = smov [#allocation5]  }
   0xf   :  { %v23_v1 = vld [vmem:[#allocation2] sm:$0xff]  ;;  %183 = vxpose.xlu1.b32.start [1/16] %v39_v0, 128  ;;  %v24_v3 = vld [vmem:[#allocation2 + $0x8] sm:$0xff]  ;;  %v41_v4 = vld [vmem:[#allocation2 + $0x90] sm:$0xff]  ;;  %s540_s13 = sshll.u32 %s603_s0, 4  ;;  %s541_s13 = int_to_ptr.vmem [resolvable:$true] %s540_s13 }
  0x10   :  { %151 = vxpose.xlu0.b32.start [1/16] %v23_v1, 128  ;;  %v25_v5 = vld [vmem:[#allocation2 + $0x10] sm:$0xff]  ;;  %v42_v6 = vld [vmem:[#allocation2 + $0x98] sm:$0xff]  ;;  %v43_v8 = vld [vmem:[#allocation2 + $0xa0] sm:$0xff]  ;;  %s576_s14 = scalar_lea.vmem %s541_s13, 16384  ;;  %p581_p6 = scmp.lt.s32.totalorder %s541_s13, %s541_s13 }
  0x11   :  { %v26_v7 = vld [vmem:[#allocation2 + $0x18] sm:$0xff]  ;;  %v27_v9 = vld [vmem:[#allocation2 + $0x20] sm:$0xff]  ;;  %v44_v10 = vld [vmem:[#allocation2 + $0xa8] sm:$0xff]  ;;  %p577_p5 = scmp.ne.s32.totalorder %s541_s13, %s576_s14  ;;  %p582_p7 = scmp.lt.s32.totalorder %s576_s14, %s576_s14 }
  0x12   :  { %v28_v11 = vld [vmem:[#allocation2 + $0x28] sm:$0xff]  ;;  %v45_v12 = vld [vmem:[#allocation2 + $0xb0] sm:$0xff]  ;;  %v46_v14 = vld [vmem:[#allocation2 + $0xb8] sm:$0xff] }
  0x13   :  { %184 = vxpose.xlu1.b32.cont [2/16] %v40_v2, 128  ;;  %v29_v13 = vld [vmem:[#allocation2 + $0x30] sm:$0xff]  ;;  %v30_v15 = vld [vmem:[#allocation2 + $0x38] sm:$0xff]  ;;  %v47_v16 = vld [vmem:[#allocation2 + $0xc0] sm:$0xff]  ;;  %p583_p8 = por %p582_p7, %p581_p6 }
  0x14   :  { %152 = vxpose.xlu0.b32.cont [2/16] %v24_v3, 128  ;;  %v31_v17 = vld [vmem:[#allocation2 + $0x40] sm:$0xff]  ;;  %v48_v18 = vld [vmem:[#allocation2 + $0xc8] sm:$0xff]  ;;  %v49_v20 = vld [vmem:[#allocation2 + $0xd0] sm:$0xff] }
  0x15   :  { %v32_v19 = vld [vmem:[#allocation2 + $0x48] sm:$0xff]  ;;  %v33_v21 = vld [vmem:[#allocation2 + $0x50] sm:$0xff]  ;;  %v50_v22 = vld [vmem:[#allocation2 + $0xd8] sm:$0xff]  ;;  %p584_p9 = pnand %p583_p8, %p577_p5 }
  0x16   :  { %v34_v23 = vld [vmem:[#allocation2 + $0x58] sm:$0xff]  ;;  %v51_v24 = vld [vmem:[#allocation2 + $0xe0] sm:$0xff]  ;;  %v52_v26 = vld [vmem:[#allocation2 + $0xe8] sm:$0xff] }
  0x17   :  { %185 = vxpose.xlu1.b32.cont [3/16] %v41_v4, 128  ;;  %v35_v25 = vld [vmem:[#allocation2 + $0x60] sm:$0xff]  ;;  %v36_v27 = vld [vmem:[#allocation2 + $0x68] sm:$0xff]  ;;  %v53_v28 = vld [vmem:[#allocation2 + $0xf0] sm:$0xff] }
  0x18   :  { %153 = vxpose.xlu0.b32.cont [3/16] %v25_v5, 128  ;;  %v37_v29 = vld [vmem:[#allocation2 + $0x70] sm:$0xff]  ;;  %v54_v30 = vld [vmem:[#allocation2 + $0xf8] sm:$0xff]  ;;  %v71_v32 = vld [vmem:[#allocation2 + $0x180] sm:$0xff] }
  0x19   :  { %v38_v31 = vld [vmem:[#allocation2 + $0x78] sm:$0xff]  ;;  %v55_v33 = vld [vmem:[#allocation2 + $0x100] sm:$0xff]  ;;  %v72_v34 = vld [vmem:[#allocation2 + $0x188] sm:$0xff] }
  0x1a   :  { %v56_v35 = vld [vmem:[#allocation2 + $0x108] sm:$0xff]  ;;  %v73_v36 = vld [vmem:[#allocation2 + $0x190] sm:$0xff]  ;;  %v74_v38 = vld [vmem:[#allocation2 + $0x198] sm:$0xff] }
  0x1b   :  { %186 = vxpose.xlu1.b32.cont [4/16] %v42_v6, 128  ;;  %v57_v37 = vld [vmem:[#allocation2 + $0x110] sm:$0xff]  ;;  %v58_v39 = vld [vmem:[#allocation2 + $0x118] sm:$0xff]  ;;  %v75_v40 = vld [vmem:[#allocation2 + $0x1a0] sm:$0xff] }
  0x1c   :  { %154 = vxpose.xlu0.b32.cont [4/16] %v26_v7, 128  ;;  %v59_v41 = vld [vmem:[#allocation2 + $0x120] sm:$0xff]  ;;  %v76_v42 = vld [vmem:[#allocation2 + $0x1a8] sm:$0xff]  ;;  %v77_v44 = vld [vmem:[#allocation2 + $0x1b0] sm:$0xff] }
  0x1d   :  { %v60_v43 = vld [vmem:[#allocation2 + $0x128] sm:$0xff]  ;;  %v61_v45 = vld [vmem:[#allocation2 + $0x130] sm:$0xff]  ;;  %v78_v46 = vld [vmem:[#allocation2 + $0x1b8] sm:$0xff] }
  0x1e   :  { %v62_v47 = vld [vmem:[#allocation2 + $0x138] sm:$0xff]  ;;  %v79_v48 = vld [vmem:[#allocation2 + $0x1c0] sm:$0xff]  ;;  %v80_v50 = vld [vmem:[#allocation2 + $0x1c8] sm:$0xff] }
  0x1f   :  { %187 = vxpose.xlu1.b32.cont [5/16] %v43_v8, 128  ;;  %v63_v49 = vld [vmem:[#allocation2 + $0x140] sm:$0xff]  ;;  %v64_v51 = vld [vmem:[#allocation2 + $0x148] sm:$0xff]  ;;  %v81_v52 = vld [vmem:[#allocation2 + $0x1d0] sm:$0xff] }
  0x20   :  { %155 = vxpose.xlu0.b32.cont [5/16] %v27_v9, 128  ;;  %v65_v53 = vld [vmem:[#allocation2 + $0x150] sm:$0xff]  ;;  %v82_v54 = vld [vmem:[#allocation2 + $0x1d8] sm:$0xff]  ;;  %v83_v56 = vld [vmem:[#allocation2 + $0x1e0] sm:$0xff] }
  0x21   :  { %v66_v55 = vld [vmem:[#allocation2 + $0x158] sm:$0xff]  ;;  %v67_v57 = vld [vmem:[#allocation2 + $0x160] sm:$0xff]  ;;  %v84_v58 = vld [vmem:[#allocation2 + $0x1e8] sm:$0xff] }
  0x22   :  { %v68_v59 = vld [vmem:[#allocation2 + $0x168] sm:$0xff]  ;;  %v85_v60 = vld [vmem:[#allocation2 + $0x1f0] sm:$0xff]  ;;  %v86_v62 = vld [vmem:[#allocation2 + $0x1f8] sm:$0xff] }
  0x23   :  { %188 = vxpose.xlu1.b32.cont [6/16] %v44_v10, 128  ;;  %v69_v61 = vld [vmem:[#allocation2 + $0x170] sm:$0xff]  ;;  %v70_v63 = vld [vmem:[#allocation2 + $0x178] sm:$0xff]  ;;  %v103_v2 = vld [vmem:[#allocation2 + $0x280] sm:$0xff] }
  0x24   :  { %156 = vxpose.xlu0.b32.cont [6/16] %v28_v11, 128  ;;  %v87_v3 = vld [vmem:[#allocation2 + $0x200] sm:$0xff]  ;;  %v104_v6 = vld [vmem:[#allocation2 + $0x288] sm:$0xff]  ;;  %v105_v10 = vld [vmem:[#allocation2 + $0x290] sm:$0xff] }
  0x25   :  { %v88_v7 = vld [vmem:[#allocation2 + $0x208] sm:$0xff]  ;;  %v89_v11 = vld [vmem:[#allocation2 + $0x210] sm:$0xff] }
  0x27   :  { %189 = vxpose.xlu1.b32.cont [7/16] %v45_v12, 128 }
  0x28   :  { %157 = vxpose.xlu0.b32.cont [7/16] %v29_v13, 128 }
  0x2b   :  { %190 = vxpose.xlu1.b32.cont [8/16] %v46_v14, 128  ;;  %v106_v14 = vld [vmem:[#allocation2 + $0x298] sm:$0xff] }
  0x2c   :  { %158 = vxpose.xlu0.b32.cont [8/16] %v30_v15, 128  ;;  %v90_v15 = vld [vmem:[#allocation2 + $0x218] sm:$0xff] }
  0x2f   :  { %191 = vxpose.xlu1.b32.cont [9/16] %v47_v16, 128 }
  0x30   :  { %159 = vxpose.xlu0.b32.cont [9/16] %v31_v17, 128 }
  0x33   :  { %192 = vxpose.xlu1.b32.cont [10/16] %v48_v18, 128  ;;  %v107_v18 = vld [vmem:[#allocation2 + $0x2a0] sm:$0xff] }
  0x34   :  { %160 = vxpose.xlu0.b32.cont [10/16] %v32_v19, 128  ;;  %v91_v19 = vld [vmem:[#allocation2 + $0x220] sm:$0xff] }
  0x37   :  { %193 = vxpose.xlu1.b32.cont [11/16] %v49_v20, 128 }
  0x38   :  { %161 = vxpose.xlu0.b32.cont [11/16] %v33_v21, 128 }
  0x3b   :  { %194 = vxpose.xlu1.b32.cont [12/16] %v50_v22, 128  ;;  %v108_v22 = vld [vmem:[#allocation2 + $0x2a8] sm:$0xff] }
  0x3c   :  { %162 = vxpose.xlu0.b32.cont [12/16] %v34_v23, 128  ;;  %v92_v23 = vld [vmem:[#allocation2 + $0x228] sm:$0xff] }
  0x3f   :  { %195 = vxpose.xlu1.b32.cont [13/16] %v51_v24, 128 }
  0x40   :  { %163 = vxpose.xlu0.b32.cont [13/16] %v35_v25, 128 }
  0x43   :  { %196 = vxpose.xlu1.b32.cont [14/16] %v52_v26, 128  ;;  %v109_v26 = vld [vmem:[#allocation2 + $0x2b0] sm:$0xff] }
  0x44   :  { %164 = vxpose.xlu0.b32.cont [14/16] %v36_v27, 128  ;;  %v93_v27 = vld [vmem:[#allocation2 + $0x230] sm:$0xff] }
  0x47   :  { %197 = vxpose.xlu1.b32.cont [15/16] %v53_v28, 128 }
  0x48   :  { %165 = vxpose.xlu0.b32.cont [15/16] %v37_v29, 128 }
  0x4b   :  { %198 = vxpose.xlu1.b32.end [16/16] %v54_v30, 128  ;;  %v110_v30 = vld [vmem:[#allocation2 + $0x2b8] sm:$0xff] }
  0x4c   :  { %166 = vxpose.xlu0.b32.end [16/16] %v38_v31, 128  ;;  %v94_v31 = vld [vmem:[#allocation2 + $0x238] sm:$0xff] }
  0x4f   :  { %247 = vxpose.xlu1.b32.start [1/16] %v71_v32, 128 }
  0x50   :  { %215 = vxpose.xlu0.b32.start [1/16] %v55_v33, 128 }
  0x53   :  { %248 = vxpose.xlu1.b32.cont [2/16] %v72_v34, 128  ;;  %v111_v34 = vld [vmem:[#allocation2 + $0x2c0] sm:$0xff] }
  0x54   :  { %216 = vxpose.xlu0.b32.cont [2/16] %v56_v35, 128  ;;  %v95_v35 = vld [vmem:[#allocation2 + $0x240] sm:$0xff] }
  0x57   :  { %249 = vxpose.xlu1.b32.cont [3/16] %v73_v36, 128 }
  0x58   :  { %217 = vxpose.xlu0.b32.cont [3/16] %v57_v37, 128 }
  0x5b   :  { %250 = vxpose.xlu1.b32.cont [4/16] %v74_v38, 128  ;;  %v112_v38 = vld [vmem:[#allocation2 + $0x2c8] sm:$0xff] }
  0x5c   :  { %218 = vxpose.xlu0.b32.cont [4/16] %v58_v39, 128  ;;  %v96_v39 = vld [vmem:[#allocation2 + $0x248] sm:$0xff] }
  0x5f   :  { %251 = vxpose.xlu1.b32.cont [5/16] %v75_v40, 128 }
  0x60   :  { %219 = vxpose.xlu0.b32.cont [5/16] %v59_v41, 128 }
  0x63   :  { %252 = vxpose.xlu1.b32.cont [6/16] %v76_v42, 128  ;;  %v113_v42 = vld [vmem:[#allocation2 + $0x2d0] sm:$0xff] }
  0x64   :  { %220 = vxpose.xlu0.b32.cont [6/16] %v60_v43, 128  ;;  %v97_v43 = vld [vmem:[#allocation2 + $0x250] sm:$0xff] }
  0x67   :  { %253 = vxpose.xlu1.b32.cont [7/16] %v77_v44, 128 }
  0x68   :  { %221 = vxpose.xlu0.b32.cont [7/16] %v61_v45, 128 }
  0x6b   :  { %254 = vxpose.xlu1.b32.cont [8/16] %v78_v46, 128  ;;  %v114_v46 = vld [vmem:[#allocation2 + $0x2d8] sm:$0xff] }
  0x6c   :  { %222 = vxpose.xlu0.b32.cont [8/16] %v62_v47, 128  ;;  %v98_v47 = vld [vmem:[#allocation2 + $0x258] sm:$0xff] }
  0x6f   :  { %255 = vxpose.xlu1.b32.cont [9/16] %v79_v48, 128 }
  0x70   :  { %223 = vxpose.xlu0.b32.cont [9/16] %v63_v49, 128 }
  0x73   :  { %256 = vxpose.xlu1.b32.cont [10/16] %v80_v50, 128  ;;  %v115_v50 = vld [vmem:[#allocation2 + $0x2e0] sm:$0xff] }
  0x74   :  { %224 = vxpose.xlu0.b32.cont [10/16] %v64_v51, 128  ;;  %v99_v51 = vld [vmem:[#allocation2 + $0x260] sm:$0xff] }
  0x77   :  { %257 = vxpose.xlu1.b32.cont [11/16] %v81_v52, 128 }
  0x78   :  { %225 = vxpose.xlu0.b32.cont [11/16] %v65_v53, 128 }
  0x7b   :  { %258 = vxpose.xlu1.b32.cont [12/16] %v82_v54, 128  ;;  %v116_v54 = vld [vmem:[#allocation2 + $0x2e8] sm:$0xff] }
  0x7c   :  { %226 = vxpose.xlu0.b32.cont [12/16] %v66_v55, 128  ;;  %v100_v55 = vld [vmem:[#allocation2 + $0x268] sm:$0xff] }
  0x7f   :  { %259 = vxpose.xlu1.b32.cont [13/16] %v83_v56, 128 }
  0x80   :  { %227 = vxpose.xlu0.b32.cont [13/16] %v67_v57, 128 }
  0x83   :  { %260 = vxpose.xlu1.b32.cont [14/16] %v84_v58, 128  ;;  %v117_v58 = vld [vmem:[#allocation2 + $0x2f0] sm:$0xff] }
  0x84   :  { %228 = vxpose.xlu0.b32.cont [14/16] %v68_v59, 128  ;;  %v101_v59 = vld [vmem:[#allocation2 + $0x270] sm:$0xff] }
  0x87   :  { %261 = vxpose.xlu1.b32.cont [15/16] %v85_v60, 128 }
  0x88   :  { %229 = vxpose.xlu0.b32.cont [15/16] %v69_v61, 128 }
  0x8b   :  { %262 = vxpose.xlu1.b32.end [16/16] %v86_v62, 128  ;;  %v199_v0 = vpop.trf.xlu1  ;;  %v118_v62 = vld [vmem:[#allocation2 + $0x2f8] sm:$0xff] }
  0x8c   :  { %230 = vxpose.xlu0.b32.end [16/16] %v70_v63, 128  ;;  %v167_v1 = vpop.trf.xlu0  ;;  %423 = vst [vmem:[#allocation5 + $0x80] sm:$0xff] %v199_v0  ;;  %v102_v63 = vld [vmem:[#allocation2 + $0x278] sm:$0xff] }
  0x8d   :  { %407 = vst [vmem:[#allocation5] sm:$0xff] %v167_v1 }
  0x8f   :  { %311 = vxpose.xlu1.b32.start [1/16] %v103_v2, 128  ;;  %v200_v4 = vpop.trf.xlu1  ;;  %v135_v2 = vld [vmem:[#allocation2 + $0x380] sm:$0xff] }
  0x90   :  { %279 = vxpose.xlu0.b32.start [1/16] %v87_v3, 128  ;;  %v168_v5 = vpop.trf.xlu0  ;;  %424 = vst [vmem:[#allocation5 + $0x88] sm:$0xff] %v200_v4  ;;  %v119_v3 = vld [vmem:[#allocation2 + $0x300] sm:$0xff] }
  0x91   :  { %408 = vst [vmem:[#allocation5 + $0x8] sm:$0xff] %v168_v5 }
  0x93   :  { %312 = vxpose.xlu1.b32.cont [2/16] %v104_v6, 128  ;;  %v201_v8 = vpop.trf.xlu1  ;;  %v136_v6 = vld [vmem:[#allocation2 + $0x388] sm:$0xff] }
  0x94   :  { %280 = vxpose.xlu0.b32.cont [2/16] %v88_v7, 128  ;;  %v169_v9 = vpop.trf.xlu0  ;;  %425 = vst [vmem:[#allocation5 + $0x90] sm:$0xff] %v201_v8  ;;  %v120_v7 = vld [vmem:[#allocation2 + $0x308] sm:$0xff] }
  0x95   :  { %409 = vst [vmem:[#allocation5 + $0x10] sm:$0xff] %v169_v9 }
  0x97   :  { %313 = vxpose.xlu1.b32.cont [3/16] %v105_v10, 128  ;;  %v202_v12 = vpop.trf.xlu1  ;;  %v137_v10 = vld [vmem:[#allocation2 + $0x390] sm:$0xff] }
  0x98   :  { %281 = vxpose.xlu0.b32.cont [3/16] %v89_v11, 128  ;;  %v170_v13 = vpop.trf.xlu0  ;;  %426 = vst [vmem:[#allocation5 + $0x98] sm:$0xff] %v202_v12  ;;  %v121_v11 = vld [vmem:[#allocation2 + $0x310] sm:$0xff] }
  0x99   :  { %410 = vst [vmem:[#allocation5 + $0x18] sm:$0xff] %v170_v13 }
  0x9b   :  { %314 = vxpose.xlu1.b32.cont [4/16] %v106_v14, 128  ;;  %v203_v16 = vpop.trf.xlu1  ;;  %v138_v14 = vld [vmem:[#allocation2 + $0x398] sm:$0xff] }
  0x9c   :  { %282 = vxpose.xlu0.b32.cont [4/16] %v90_v15, 128  ;;  %v171_v17 = vpop.trf.xlu0  ;;  %427 = vst [vmem:[#allocation5 + $0xa0] sm:$0xff] %v203_v16  ;;  %v122_v15 = vld [vmem:[#allocation2 + $0x318] sm:$0xff] }
  0x9d   :  { %411 = vst [vmem:[#allocation5 + $0x20] sm:$0xff] %v171_v17 }
  0x9f   :  { %315 = vxpose.xlu1.b32.cont [5/16] %v107_v18, 128  ;;  %v204_v20 = vpop.trf.xlu1  ;;  %v139_v18 = vld [vmem:[#allocation2 + $0x3a0] sm:$0xff] }
  0xa0   :  { %283 = vxpose.xlu0.b32.cont [5/16] %v91_v19, 128  ;;  %v172_v21 = vpop.trf.xlu0  ;;  %428 = vst [vmem:[#allocation5 + $0xa8] sm:$0xff] %v204_v20  ;;  %v123_v19 = vld [vmem:[#allocation2 + $0x320] sm:$0xff] }
  0xa1   :  { %412 = vst [vmem:[#allocation5 + $0x28] sm:$0xff] %v172_v21 }
  0xa3   :  { %316 = vxpose.xlu1.b32.cont [6/16] %v108_v22, 128  ;;  %v205_v24 = vpop.trf.xlu1  ;;  %v140_v22 = vld [vmem:[#allocation2 + $0x3a8] sm:$0xff] }
  0xa4   :  { %284 = vxpose.xlu0.b32.cont [6/16] %v92_v23, 128  ;;  %v173_v25 = vpop.trf.xlu0  ;;  %429 = vst [vmem:[#allocation5 + $0xb0] sm:$0xff] %v205_v24  ;;  %v124_v23 = vld [vmem:[#allocation2 + $0x328] sm:$0xff] }
  0xa5   :  { %413 = vst [vmem:[#allocation5 + $0x30] sm:$0xff] %v173_v25 }
  0xa7   :  { %317 = vxpose.xlu1.b32.cont [7/16] %v109_v26, 128  ;;  %v206_v28 = vpop.trf.xlu1  ;;  %v141_v26 = vld [vmem:[#allocation2 + $0x3b0] sm:$0xff] }
  0xa8   :  { %285 = vxpose.xlu0.b32.cont [7/16] %v93_v27, 128  ;;  %v174_v29 = vpop.trf.xlu0  ;;  %430 = vst [vmem:[#allocation5 + $0xb8] sm:$0xff] %v206_v28  ;;  %v125_v27 = vld [vmem:[#allocation2 + $0x330] sm:$0xff] }
  0xa9   :  { %414 = vst [vmem:[#allocation5 + $0x38] sm:$0xff] %v174_v29 }
  0xab   :  { %318 = vxpose.xlu1.b32.cont [8/16] %v110_v30, 128  ;;  %v207_v32 = vpop.trf.xlu1  ;;  %v142_v30 = vld [vmem:[#allocation2 + $0x3b8] sm:$0xff] }
  0xac   :  { %286 = vxpose.xlu0.b32.cont [8/16] %v94_v31, 128  ;;  %v175_v33 = vpop.trf.xlu0  ;;  %431 = vst [vmem:[#allocation5 + $0xc0] sm:$0xff] %v207_v32  ;;  %v126_v31 = vld [vmem:[#allocation2 + $0x338] sm:$0xff] }
  0xad   :  { %415 = vst [vmem:[#allocation5 + $0x40] sm:$0xff] %v175_v33 }
  0xaf   :  { %319 = vxpose.xlu1.b32.cont [9/16] %v111_v34, 128  ;;  %v208_v36 = vpop.trf.xlu1  ;;  %v143_v34 = vld [vmem:[#allocation2 + $0x3c0] sm:$0xff] }
  0xb0   :  { %287 = vxpose.xlu0.b32.cont [9/16] %v95_v35, 128  ;;  %v176_v37 = vpop.trf.xlu0  ;;  %432 = vst [vmem:[#allocation5 + $0xc8] sm:$0xff] %v208_v36  ;;  %v127_v35 = vld [vmem:[#allocation2 + $0x340] sm:$0xff] }
  0xb1   :  { %416 = vst [vmem:[#allocation5 + $0x48] sm:$0xff] %v176_v37 }
  0xb3   :  { %320 = vxpose.xlu1.b32.cont [10/16] %v112_v38, 128  ;;  %v209_v40 = vpop.trf.xlu1  ;;  %v144_v38 = vld [vmem:[#allocation2 + $0x3c8] sm:$0xff] }
  0xb4   :  { %288 = vxpose.xlu0.b32.cont [10/16] %v96_v39, 128  ;;  %v177_v41 = vpop.trf.xlu0  ;;  %433 = vst [vmem:[#allocation5 + $0xd0] sm:$0xff] %v209_v40  ;;  %v128_v39 = vld [vmem:[#allocation2 + $0x348] sm:$0xff] }
  0xb5   :  { %417 = vst [vmem:[#allocation5 + $0x50] sm:$0xff] %v177_v41 }
  0xb7   :  { %321 = vxpose.xlu1.b32.cont [11/16] %v113_v42, 128  ;;  %v210_v44 = vpop.trf.xlu1  ;;  %v145_v42 = vld [vmem:[#allocation2 + $0x3d0] sm:$0xff] }
  0xb8   :  { %289 = vxpose.xlu0.b32.cont [11/16] %v97_v43, 128  ;;  %v178_v45 = vpop.trf.xlu0  ;;  %434 = vst [vmem:[#allocation5 + $0xd8] sm:$0xff] %v210_v44  ;;  %v129_v43 = vld [vmem:[#allocation2 + $0x350] sm:$0xff] }
  0xb9   :  { %418 = vst [vmem:[#allocation5 + $0x58] sm:$0xff] %v178_v45 }
  0xbb   :  { %322 = vxpose.xlu1.b32.cont [12/16] %v114_v46, 128  ;;  %v211_v48 = vpop.trf.xlu1  ;;  %v146_v46 = vld [vmem:[#allocation2 + $0x3d8] sm:$0xff] }
  0xbc   :  { %290 = vxpose.xlu0.b32.cont [12/16] %v98_v47, 128  ;;  %v179_v49 = vpop.trf.xlu0  ;;  %435 = vst [vmem:[#allocation5 + $0xe0] sm:$0xff] %v211_v48  ;;  %v130_v47 = vld [vmem:[#allocation2 + $0x358] sm:$0xff] }
  0xbd   :  { %419 = vst [vmem:[#allocation5 + $0x60] sm:$0xff] %v179_v49 }
  0xbf   :  { %323 = vxpose.xlu1.b32.cont [13/16] %v115_v50, 128  ;;  %v212_v52 = vpop.trf.xlu1  ;;  %v147_v50 = vld [vmem:[#allocation2 + $0x3e0] sm:$0xff] }
  0xc0   :  { %291 = vxpose.xlu0.b32.cont [13/16] %v99_v51, 128  ;;  %v180_v53 = vpop.trf.xlu0  ;;  %436 = vst [vmem:[#allocation5 + $0xe8] sm:$0xff] %v212_v52  ;;  %v131_v51 = vld [vmem:[#allocation2 + $0x360] sm:$0xff] }
  0xc1   :  { %420 = vst [vmem:[#allocation5 + $0x68] sm:$0xff] %v180_v53 }
  0xc3   :  { %324 = vxpose.xlu1.b32.cont [14/16] %v116_v54, 128  ;;  %v213_v56 = vpop.trf.xlu1  ;;  %v148_v54 = vld [vmem:[#allocation2 + $0x3e8] sm:$0xff] }
  0xc4   :  { %292 = vxpose.xlu0.b32.cont [14/16] %v100_v55, 128  ;;  %v181_v57 = vpop.trf.xlu0  ;;  %437 = vst [vmem:[#allocation5 + $0xf0] sm:$0xff] %v213_v56  ;;  %v132_v55 = vld [vmem:[#allocation2 + $0x368] sm:$0xff] }
  0xc5   :  { %421 = vst [vmem:[#allocation5 + $0x70] sm:$0xff] %v181_v57 }
  0xc7   :  { %325 = vxpose.xlu1.b32.cont [15/16] %v117_v58, 128  ;;  %v214_v60 = vpop.trf.xlu1  ;;  %v149_v58 = vld [vmem:[#allocation2 + $0x3f0] sm:$0xff] }
  0xc8   :  { %293 = vxpose.xlu0.b32.cont [15/16] %v101_v59, 128  ;;  %v182_v61 = vpop.trf.xlu0  ;;  %438 = vst [vmem:[#allocation5 + $0xf8] sm:$0xff] %v214_v60  ;;  %v133_v59 = vld [vmem:[#allocation2 + $0x370] sm:$0xff] }
  0xc9   :  { %422 = vst [vmem:[#allocation5 + $0x78] sm:$0xff] %v182_v61 }
  0xcb   :  { %326 = vxpose.xlu1.b32.end [16/16] %v118_v62, 128  ;;  %v263_v0 = vpop.trf.xlu1  ;;  %v150_v62 = vld [vmem:[#allocation2 + $0x3f8] sm:$0xff] }
  0xcc   :  { %294 = vxpose.xlu0.b32.end [16/16] %v102_v63, 128  ;;  %v231_v1 = vpop.trf.xlu0  ;;  %455 = vst [vmem:[#allocation5 + $0x180] sm:$0xff] %v263_v0  ;;  %v134_v63 = vld [vmem:[#allocation2 + $0x378] sm:$0xff] }
  0xcd   :  { %439 = vst [vmem:[#allocation5 + $0x100] sm:$0xff] %v231_v1 }
  0xcf   :  { %375 = vxpose.xlu1.b32.start [1/16] %v135_v2, 128  ;;  %v264_v4 = vpop.trf.xlu1 }
  0xd0   :  { %343 = vxpose.xlu0.b32.start [1/16] %v119_v3, 128  ;;  %v232_v5 = vpop.trf.xlu0  ;;  %456 = vst [vmem:[#allocation5 + $0x188] sm:$0xff] %v264_v4 }
  0xd1   :  { %440 = vst [vmem:[#allocation5 + $0x108] sm:$0xff] %v232_v5 }
  0xd3   :  { %376 = vxpose.xlu1.b32.cont [2/16] %v136_v6, 128  ;;  %v265_v8 = vpop.trf.xlu1 }
  0xd4   :  { %344 = vxpose.xlu0.b32.cont [2/16] %v120_v7, 128  ;;  %v233_v9 = vpop.trf.xlu0  ;;  %457 = vst [vmem:[#allocation5 + $0x190] sm:$0xff] %v265_v8 }
  0xd5   :  { %441 = vst [vmem:[#allocation5 + $0x110] sm:$0xff] %v233_v9 }
  0xd7   :  { %377 = vxpose.xlu1.b32.cont [3/16] %v137_v10, 128  ;;  %v266_v12 = vpop.trf.xlu1 }
  0xd8   :  { %345 = vxpose.xlu0.b32.cont [3/16] %v121_v11, 128  ;;  %v234_v13 = vpop.trf.xlu0  ;;  %458 = vst [vmem:[#allocation5 + $0x198] sm:$0xff] %v266_v12 }
  0xd9   :  { %442 = vst [vmem:[#allocation5 + $0x118] sm:$0xff] %v234_v13 }
  0xdb   :  { %378 = vxpose.xlu1.b32.cont [4/16] %v138_v14, 128  ;;  %v267_v16 = vpop.trf.xlu1 }
  0xdc   :  { %346 = vxpose.xlu0.b32.cont [4/16] %v122_v15, 128  ;;  %v235_v17 = vpop.trf.xlu0  ;;  %459 = vst [vmem:[#allocation5 + $0x1a0] sm:$0xff] %v267_v16 }
  0xdd   :  { %443 = vst [vmem:[#allocation5 + $0x120] sm:$0xff] %v235_v17 }
  0xdf   :  { %379 = vxpose.xlu1.b32.cont [5/16] %v139_v18, 128  ;;  %v268_v20 = vpop.trf.xlu1 }
  0xe0   :  { %347 = vxpose.xlu0.b32.cont [5/16] %v123_v19, 128  ;;  %v236_v21 = vpop.trf.xlu0  ;;  %460 = vst [vmem:[#allocation5 + $0x1a8] sm:$0xff] %v268_v20 }
  0xe1   :  { %444 = vst [vmem:[#allocation5 + $0x128] sm:$0xff] %v236_v21 }
  0xe3   :  { %380 = vxpose.xlu1.b32.cont [6/16] %v140_v22, 128  ;;  %v269_v24 = vpop.trf.xlu1 }
  0xe4   :  { %348 = vxpose.xlu0.b32.cont [6/16] %v124_v23, 128  ;;  %v237_v25 = vpop.trf.xlu0  ;;  %461 = vst [vmem:[#allocation5 + $0x1b0] sm:$0xff] %v269_v24 }
  0xe5   :  { %445 = vst [vmem:[#allocation5 + $0x130] sm:$0xff] %v237_v25 }
  0xe7   :  { %381 = vxpose.xlu1.b32.cont [7/16] %v141_v26, 128  ;;  %v270_v28 = vpop.trf.xlu1 }
  0xe8   :  { %349 = vxpose.xlu0.b32.cont [7/16] %v125_v27, 128  ;;  %v238_v29 = vpop.trf.xlu0  ;;  %462 = vst [vmem:[#allocation5 + $0x1b8] sm:$0xff] %v270_v28 }
  0xe9   :  { %446 = vst [vmem:[#allocation5 + $0x138] sm:$0xff] %v238_v29 }
  0xeb   :  { %382 = vxpose.xlu1.b32.cont [8/16] %v142_v30, 128  ;;  %v271_v32 = vpop.trf.xlu1 }
  0xec   :  { %350 = vxpose.xlu0.b32.cont [8/16] %v126_v31, 128  ;;  %v239_v33 = vpop.trf.xlu0  ;;  %463 = vst [vmem:[#allocation5 + $0x1c0] sm:$0xff] %v271_v32 }
  0xed   :  { %447 = vst [vmem:[#allocation5 + $0x140] sm:$0xff] %v239_v33 }
  0xef   :  { %383 = vxpose.xlu1.b32.cont [9/16] %v143_v34, 128  ;;  %v272_v36 = vpop.trf.xlu1 }
  0xf0   :  { %351 = vxpose.xlu0.b32.cont [9/16] %v127_v35, 128  ;;  %v240_v37 = vpop.trf.xlu0  ;;  %464 = vst [vmem:[#allocation5 + $0x1c8] sm:$0xff] %v272_v36 }
  0xf1   :  { %448 = vst [vmem:[#allocation5 + $0x148] sm:$0xff] %v240_v37 }
  0xf3   :  { %384 = vxpose.xlu1.b32.cont [10/16] %v144_v38, 128  ;;  %v273_v40 = vpop.trf.xlu1 }
  0xf4   :  { %352 = vxpose.xlu0.b32.cont [10/16] %v128_v39, 128  ;;  %v241_v41 = vpop.trf.xlu0  ;;  %465 = vst [vmem:[#allocation5 + $0x1d0] sm:$0xff] %v273_v40 }
  0xf5   :  { %449 = vst [vmem:[#allocation5 + $0x150] sm:$0xff] %v241_v41 }
  0xf7   :  { %385 = vxpose.xlu1.b32.cont [11/16] %v145_v42, 128  ;;  %v274_v44 = vpop.trf.xlu1 }
  0xf8   :  { %353 = vxpose.xlu0.b32.cont [11/16] %v129_v43, 128  ;;  %v242_v45 = vpop.trf.xlu0  ;;  %466 = vst [vmem:[#allocation5 + $0x1d8] sm:$0xff] %v274_v44 }
  0xf9   :  { %450 = vst [vmem:[#allocation5 + $0x158] sm:$0xff] %v242_v45 }
  0xfb   :  { %386 = vxpose.xlu1.b32.cont [12/16] %v146_v46, 128  ;;  %v275_v48 = vpop.trf.xlu1 }
  0xfc   :  { %354 = vxpose.xlu0.b32.cont [12/16] %v130_v47, 128  ;;  %v243_v49 = vpop.trf.xlu0  ;;  %467 = vst [vmem:[#allocation5 + $0x1e0] sm:$0xff] %v275_v48 }
  0xfd   :  { %451 = vst [vmem:[#allocation5 + $0x160] sm:$0xff] %v243_v49 }
  0xff   :  { %387 = vxpose.xlu1.b32.cont [13/16] %v147_v50, 128  ;;  %v276_v52 = vpop.trf.xlu1 }
 0x100   :  { %355 = vxpose.xlu0.b32.cont [13/16] %v131_v51, 128  ;;  %v244_v53 = vpop.trf.xlu0  ;;  %468 = vst [vmem:[#allocation5 + $0x1e8] sm:$0xff] %v276_v52 }
 0x101   :  { %452 = vst [vmem:[#allocation5 + $0x168] sm:$0xff] %v244_v53 }
 0x103   :  { %388 = vxpose.xlu1.b32.cont [14/16] %v148_v54, 128  ;;  %v277_v56 = vpop.trf.xlu1 }
 0x104   :  { %356 = vxpose.xlu0.b32.cont [14/16] %v132_v55, 128  ;;  %v245_v57 = vpop.trf.xlu0  ;;  %469 = vst [vmem:[#allocation5 + $0x1f0] sm:$0xff] %v277_v56 }
 0x105   :  { %453 = vst [vmem:[#allocation5 + $0x170] sm:$0xff] %v245_v57 }
 0x107   :  { %389 = vxpose.xlu1.b32.cont [15/16] %v149_v58, 128  ;;  %v278_v60 = vpop.trf.xlu1 }
 0x108   :  { %357 = vxpose.xlu0.b32.cont [15/16] %v133_v59, 128  ;;  %v246_v61 = vpop.trf.xlu0  ;;  %470 = vst [vmem:[#allocation5 + $0x1f8] sm:$0xff] %v278_v60 }
 0x109   :  { %454 = vst [vmem:[#allocation5 + $0x178] sm:$0xff] %v246_v61 }
 0x10b   :  { %390 = vxpose.xlu1.b32.end [16/16] %v150_v62, 128  ;;  %v327_v0 = vpop.trf.xlu1 }
 0x10c   :  { %358 = vxpose.xlu0.b32.end [16/16] %v134_v63, 128  ;;  %v295_v1 = vpop.trf.xlu0  ;;  %487 = vst [vmem:[#allocation5 + $0x280] sm:$0xff] %v327_v0 }
 0x10d   :  { %471 = vst [vmem:[#allocation5 + $0x200] sm:$0xff] %v295_v1 }
 0x10f   :  { %v328_v2 = vpop.trf.xlu1 }
 0x110   :  { %v296_v3 = vpop.trf.xlu0  ;;  %488 = vst [vmem:[#allocation5 + $0x288] sm:$0xff] %v328_v2 }
 0x111   :  { %472 = vst [vmem:[#allocation5 + $0x208] sm:$0xff] %v296_v3 }
 0x113   :  { %v329_v4 = vpop.trf.xlu1 }
 0x114   :  { %v297_v5 = vpop.trf.xlu0  ;;  %489 = vst [vmem:[#allocation5 + $0x290] sm:$0xff] %v329_v4 }
 0x115   :  { %473 = vst [vmem:[#allocation5 + $0x210] sm:$0xff] %v297_v5 }
 0x117   :  { %v330_v6 = vpop.trf.xlu1 }
 0x118   :  { %v298_v7 = vpop.trf.xlu0  ;;  %490 = vst [vmem:[#allocation5 + $0x298] sm:$0xff] %v330_v6 }
 0x119   :  { %474 = vst [vmem:[#allocation5 + $0x218] sm:$0xff] %v298_v7 }
 0x11b   :  { %v331_v8 = vpop.trf.xlu1 }
 0x11c   :  { %v299_v9 = vpop.trf.xlu0  ;;  %491 = vst [vmem:[#allocation5 + $0x2a0] sm:$0xff] %v331_v8 }
 0x11d   :  { %475 = vst [vmem:[#allocation5 + $0x220] sm:$0xff] %v299_v9 }
 0x11f   :  { %v332_v10 = vpop.trf.xlu1 }
 0x120   :  { %v300_v11 = vpop.trf.xlu0  ;;  %492 = vst [vmem:[#allocation5 + $0x2a8] sm:$0xff] %v332_v10 }
 0x121   :  { %476 = vst [vmem:[#allocation5 + $0x228] sm:$0xff] %v300_v11 }
 0x123   :  { %v333_v12 = vpop.trf.xlu1 }
 0x124   :  { %v301_v13 = vpop.trf.xlu0  ;;  %493 = vst [vmem:[#allocation5 + $0x2b0] sm:$0xff] %v333_v12 }
 0x125   :  { %477 = vst [vmem:[#allocation5 + $0x230] sm:$0xff] %v301_v13 }
 0x127   :  { %v334_v14 = vpop.trf.xlu1 }
 0x128   :  { %v302_v15 = vpop.trf.xlu0  ;;  %494 = vst [vmem:[#allocation5 + $0x2b8] sm:$0xff] %v334_v14 }
 0x129   :  { %478 = vst [vmem:[#allocation5 + $0x238] sm:$0xff] %v302_v15 }
 0x12b   :  { %v335_v16 = vpop.trf.xlu1 }
 0x12c   :  { %v303_v17 = vpop.trf.xlu0  ;;  %495 = vst [vmem:[#allocation5 + $0x2c0] sm:$0xff] %v335_v16 }
 0x12d   :  { %479 = vst [vmem:[#allocation5 + $0x240] sm:$0xff] %v303_v17 }
 0x12f   :  { %v336_v18 = vpop.trf.xlu1 }
 0x130   :  { %v304_v19 = vpop.trf.xlu0  ;;  %496 = vst [vmem:[#allocation5 + $0x2c8] sm:$0xff] %v336_v18 }
 0x131   :  { %480 = vst [vmem:[#allocation5 + $0x248] sm:$0xff] %v304_v19 }
 0x133   :  { %v337_v20 = vpop.trf.xlu1 }
 0x134   :  { %v305_v21 = vpop.trf.xlu0  ;;  %497 = vst [vmem:[#allocation5 + $0x2d0] sm:$0xff] %v337_v20 }
 0x135   :  { %481 = vst [vmem:[#allocation5 + $0x250] sm:$0xff] %v305_v21 }
 0x137   :  { %v338_v22 = vpop.trf.xlu1 }
 0x138   :  { %v306_v23 = vpop.trf.xlu0  ;;  %498 = vst [vmem:[#allocation5 + $0x2d8] sm:$0xff] %v338_v22 }
 0x139   :  { %482 = vst [vmem:[#allocation5 + $0x258] sm:$0xff] %v306_v23 }
 0x13b   :  { %v339_v24 = vpop.trf.xlu1 }
 0x13c   :  { %v307_v25 = vpop.trf.xlu0  ;;  %499 = vst [vmem:[#allocation5 + $0x2e0] sm:$0xff] %v339_v24 }
 0x13d   :  { %483 = vst [vmem:[#allocation5 + $0x260] sm:$0xff] %v307_v25 }
 0x13f   :  { %v340_v26 = vpop.trf.xlu1 }
 0x140   :  { %v308_v27 = vpop.trf.xlu0  ;;  %500 = vst [vmem:[#allocation5 + $0x2e8] sm:$0xff] %v340_v26 }
 0x141   :  { %484 = vst [vmem:[#allocation5 + $0x268] sm:$0xff] %v308_v27 }
 0x143   :  { %v341_v28 = vpop.trf.xlu1 }
 0x144   :  { %v309_v29 = vpop.trf.xlu0  ;;  %501 = vst [vmem:[#allocation5 + $0x2f0] sm:$0xff] %v341_v28 }
 0x145   :  { %485 = vst [vmem:[#allocation5 + $0x270] sm:$0xff] %v309_v29 }
 0x147   :  { %v342_v30 = vpop.trf.xlu1 }
 0x148   :  { %v310_v31 = vpop.trf.xlu0  ;;  %502 = vst [vmem:[#allocation5 + $0x2f8] sm:$0xff] %v342_v30 }
 0x149   :  { %486 = vst [vmem:[#allocation5 + $0x278] sm:$0xff] %v310_v31 }
 0x14b   :  { %v391_v32 = vpop.trf.xlu1 }
 0x14c   :  { %v359_v33 = vpop.trf.xlu0  ;;  %519 = vst [vmem:[#allocation5 + $0x380] sm:$0xff] %v391_v32 }
 0x14d   :  { %503 = vst [vmem:[#allocation5 + $0x300] sm:$0xff] %v359_v33 }
 0x14f   :  { %v392_v34 = vpop.trf.xlu1 }
 0x150   :  { %v360_v35 = vpop.trf.xlu0  ;;  %520 = vst [vmem:[#allocation5 + $0x388] sm:$0xff] %v392_v34 }
 0x151   :  { %504 = vst [vmem:[#allocation5 + $0x308] sm:$0xff] %v360_v35 }
 0x153   :  { %v393_v36 = vpop.trf.xlu1 }
 0x154   :  { %v361_v37 = vpop.trf.xlu0  ;;  %521 = vst [vmem:[#allocation5 + $0x390] sm:$0xff] %v393_v36 }
 0x155   :  { %505 = vst [vmem:[#allocation5 + $0x310] sm:$0xff] %v361_v37 }
 0x157   :  { %v394_v38 = vpop.trf.xlu1 }
 0x158   :  { %v362_v39 = vpop.trf.xlu0  ;;  %522 = vst [vmem:[#allocation5 + $0x398] sm:$0xff] %v394_v38 }
 0x159   :  { %506 = vst [vmem:[#allocation5 + $0x318] sm:$0xff] %v362_v39 }
 0x15b   :  { %v395_v40 = vpop.trf.xlu1 }
 0x15c   :  { %v363_v41 = vpop.trf.xlu0  ;;  %523 = vst [vmem:[#allocation5 + $0x3a0] sm:$0xff] %v395_v40 }
 0x15d   :  { %507 = vst [vmem:[#allocation5 + $0x320] sm:$0xff] %v363_v41 }
 0x15f   :  { %v396_v42 = vpop.trf.xlu1 }
 0x160   :  { %v364_v43 = vpop.trf.xlu0  ;;  %524 = vst [vmem:[#allocation5 + $0x3a8] sm:$0xff] %v396_v42 }
 0x161   :  { %508 = vst [vmem:[#allocation5 + $0x328] sm:$0xff] %v364_v43 }
 0x163   :  { %v397_v44 = vpop.trf.xlu1 }
 0x164   :  { %v365_v45 = vpop.trf.xlu0  ;;  %525 = vst [vmem:[#allocation5 + $0x3b0] sm:$0xff] %v397_v44 }
 0x165   :  { %509 = vst [vmem:[#allocation5 + $0x330] sm:$0xff] %v365_v45 }
 0x167   :  { %v398_v46 = vpop.trf.xlu1 }
 0x168   :  { %v366_v47 = vpop.trf.xlu0  ;;  %526 = vst [vmem:[#allocation5 + $0x3b8] sm:$0xff] %v398_v46 }
 0x169   :  { %510 = vst [vmem:[#allocation5 + $0x338] sm:$0xff] %v366_v47 }
 0x16b   :  { %v399_v48 = vpop.trf.xlu1 }
 0x16c   :  { %v367_v49 = vpop.trf.xlu0  ;;  %527 = vst [vmem:[#allocation5 + $0x3c0] sm:$0xff] %v399_v48 }
 0x16d   :  { %511 = vst [vmem:[#allocation5 + $0x340] sm:$0xff] %v367_v49 }
 0x16f   :  { %v400_v50 = vpop.trf.xlu1 }
 0x170   :  { %v368_v51 = vpop.trf.xlu0  ;;  %528 = vst [vmem:[#allocation5 + $0x3c8] sm:$0xff] %v400_v50 }
 0x171   :  { %512 = vst [vmem:[#allocation5 + $0x348] sm:$0xff] %v368_v51 }
 0x173   :  { %v401_v52 = vpop.trf.xlu1 }
 0x174   :  { %v369_v53 = vpop.trf.xlu0  ;;  %529 = vst [vmem:[#allocation5 + $0x3d0] sm:$0xff] %v401_v52 }
 0x175   :  { %513 = vst [vmem:[#allocation5 + $0x350] sm:$0xff] %v369_v53 }
 0x177   :  { %v402_v54 = vpop.trf.xlu1 }
 0x178   :  { %v370_v55 = vpop.trf.xlu0  ;;  %530 = vst [vmem:[#allocation5 + $0x3d8] sm:$0xff] %v402_v54 }
 0x179   :  { %514 = vst [vmem:[#allocation5 + $0x358] sm:$0xff] %v370_v55 }
 0x17b   :  { %v403_v56 = vpop.trf.xlu1 }
 0x17c   :  { %v371_v57 = vpop.trf.xlu0  ;;  %531 = vst [vmem:[#allocation5 + $0x3e0] sm:$0xff] %v403_v56 }
 0x17d   :  { %515 = vst [vmem:[#allocation5 + $0x360] sm:$0xff] %v371_v57 }
 0x17f   :  { %v404_v58 = vpop.trf.xlu1 }
 0x180   :  { %v372_v59 = vpop.trf.xlu0  ;;  %532 = vst [vmem:[#allocation5 + $0x3e8] sm:$0xff] %v404_v58 }
 0x181   :  { %516 = vst [vmem:[#allocation5 + $0x368] sm:$0xff] %v372_v59 }
 0x183   :  { %v405_v60 = vpop.trf.xlu1 }
 0x184   :  { %v373_v61 = vpop.trf.xlu0  ;;  %533 = vst [vmem:[#allocation5 + $0x3f0] sm:$0xff] %v405_v60 }
 0x185   :  { %517 = vst [vmem:[#allocation5 + $0x370] sm:$0xff] %v373_v61 }
 0x187   :  { %v406_v62 = vpop.trf.xlu1 }
 0x188   :  { %v374_v63 = vpop.trf.xlu0  ;;  %534 = vst [vmem:[#allocation5 + $0x3f8] sm:$0xff] %v406_v62 }
 0x189   :  { %518 = vst [vmem:[#allocation5 + $0x378] sm:$0xff] %v374_v63 }
 0x18a   :  { %587 = shalt.err (!%p584_p9)
}
 0x18b   :  { %546 = dma.vmem_to_hbm [thread:$0]  %s541_s13, 16384, %s627_s1, [#allocation4], %s601_s9, %s601_s9, %s602_s10  }
 0x18c   :  { %598 = dma.done.wait [#allocation4], 16384  }
 0x18d   :  { %599 = vsyncadd [#allocation4], 4294950912 }
 0x18e   :  { %550 = vsyncpa [#allocation3], 1 }
 0x18f   :  { %551 = vsyncpa [#allocation4], 1 }

</bundles_post_ra>
